<compile_context>
chip_gen: v7x
topology: tpu7x:2x2x1
jax: 0.10.0
libtpu: 0.0.40
codegen_flags: <defaults>
</compile_context>

<pallas_src>
import jax
import jax.numpy as jnp
from jax.experimental import pallas as pl
from jax.experimental.pallas import tpu as pltpu

LANE = 128


def _round_up(n, m):
    return ((n + m - 1) // m) * m


def _pad2d(a, rows, cols):
    return jnp.pad(a, ((0, rows - a.shape[0]), (0, cols - a.shape[1])))


def _mlp_trunk(x, w1_ref, b1_ref, w2_ref, b2_ref, w3_ref, b3_ref):
    """Shared fc1..fc3 + ReLU trunk.  Returns f32 [rows, 128]."""
    cdt = w1_ref.dtype          # MXU operand dtype (f32, or bf16 on v5e)
    h = x.astype(cdt)
    h = jnp.dot(h, w1_ref[...], preferred_element_type=jnp.float32) + b1_ref[...]
    h = jnp.maximum(h, 0.0).astype(cdt)
    h = jnp.dot(h, w2_ref[...], preferred_element_type=jnp.float32) + b2_ref[...]
    h = jnp.maximum(h, 0.0).astype(cdt)
    h = jnp.dot(h, w3_ref[...], preferred_element_type=jnp.float32) + b3_ref[...]
    return jnp.maximum(h, 0.0)   # f32 [rows, 128]


def mlp_kernel_small(x_ref, w1_ref, b1_ref, w2_ref, b2_ref, w3_ref, b3_ref,
                     w4_ref, b4_ref, o_ref):
    """No-grid path: whole arrays VMEM-resident.  Output kept as a 128-lane
    broadcast slab; at small B this path is dispatch/latency-bound so the
    redundant writeback is irrelevant."""
    h = _mlp_trunk(x_ref[...], w1_ref, b1_ref, w2_ref, b2_ref, w3_ref, b3_ref)
    y = jnp.dot(h, w4_ref[...].astype(jnp.float32),
                preferred_element_type=jnp.float32) + b4_ref[...]      # [B, 1]
    o_ref[...] = jnp.broadcast_to(y, o_ref.shape).astype(o_ref.dtype)


def mlp_kernel_packed(x_ref, w1_ref, b1_ref, w2_ref, b2_ref, w3_ref, b3_ref,
                      w4_ref, b4_ref, o_ref):
    """Batch-tiled path: lane-packed [1, tb] output (4 B per result).
    The [tb, 128] -> [128, tb] transpose has both dims as 128-multiples and the
    final 16->1 layer is a VPU multiply + sublane reduce (MXU stays free)."""
    h = _mlp_trunk(x_ref[...], w1_ref, b1_ref, w2_ref, b2_ref, w3_ref, b3_ref)
    ht = h.T                                                          # [128, tb]
    y = jnp.sum(ht * w4_ref[...], axis=0, keepdims=True) + b4_ref[...]  # [1, tb]
    o_ref[...] = y.astype(o_ref.dtype)


def pack_params(params, dtype=jnp.float32):
    """Zero-pad every hidden dim to a multiple of 128 lanes:
       fc1..fc3 weights -> [in_p, out_p], biases -> [1, out_p],
       fc4 weight -> [128, 1] column, bias -> [1, 1].
    `dtype` casts the weights only (biases stay f32); pass jnp.bfloat16 on
    MXU-bound v5e if the accuracy budget allows."""
    (w1, b1), (w2, b2), (w3, b3), (w4, b4) = params
    d0 = w1.shape[0]
    d1 = _round_up(w1.shape[1], LANE)   # 300 -> 384
    d2 = _round_up(w2.shape[1], LANE)   # 100 -> 128
    d3 = _round_up(w3.shape[1], LANE)   # 16  -> 128
    w1p = _pad2d(w1, d0, d1).astype(dtype)
    b1p = _pad2d(b1, 1, d1)
    w2p = _pad2d(w2, d1, d2).astype(dtype)
    b2p = _pad2d(b2, 1, d2)
    w3p = _pad2d(w3, d2, d3).astype(dtype)
    b3p = _pad2d(b3, 1, d3)
    w4c = _pad2d(w4, d3, 1).astype(dtype)      # [16, 1] -> [128, 1]
    b4p = b4.reshape(1, 1).astype(jnp.float32)
    return (w1p, b1p, w2p, b2p, w3p, b3p, w4c, b4p)


def baseline_1_forward(x, packed, *, batch_tile=1024):
    """x: [B, in_channels] float32.  Returns [B, 1] float32.

    batch_tile: rows per grid step on the large-batch path.  1024 amortizes the
    ~0.35 us per-grid-step overhead; sweep 512/1024/2048 per chip.  VMEM use is
    a few MB even at 2048, so no vmem_limit override is needed on v5e/v6e/v7x.
    Do NOT shrink to 128 on v5e: the MXU streams M, smaller tiles only raise the
    overhead fraction."""
    w1p, b1p, w2p, b2p, w3p, b3p, w4c, b4p = packed
    B, fin = x.shape
    d1, d2, d3 = w1p.shape[1], w2p.shape[1], w3p.shape[1]

    flops = 2 * B * (fin * d1 + d1 * d2 + d2 * d3 + d3)
    param_bytes = sum(int(p.size) * p.dtype.itemsize for p in packed)
    in_bytes = B * fin * x.dtype.itemsize

    if B <= batch_tile:
        # Small batch: single invocation, no pipelined grid, no padding of x
        # (whole-array VMEM operands; Mosaic pads internally).
        vmem = pl.BlockSpec(memory_space=pltpu.MemorySpace.VMEM)
        cost = pl.CostEstimate(
            flops=flops, transcendentals=0,
            bytes_accessed=in_bytes + param_bytes + B * LANE * 4)
        out = pl.pallas_call(
            mlp_kernel_small,
            out_shape=jax.ShapeDtypeStruct((B, LANE), jnp.float32),
            in_specs=[vmem] * 9,
            out_specs=vmem,
            cost_estimate=cost,
        )(x, *packed)
        return out[:, :1]

    # Large batch: batch-tiled "parallel" grid.  No wrapper-side padding of x:
    # grid = cdiv(B, tb) and Pallas masks the partial last block (rows are
    # independent, so garbage rows only reach masked / sliced-off outputs).
    # The tile count is rounded up to an even number so both v7x TensorCores get
    # work, and tiles are rebalanced to ~B / num_tiles rows each.
    num_tiles = pl.cdiv(B, batch_tile)
    if num_tiles % 2:
        num_tiles += 1
    tb = _round_up(pl.cdiv(B, num_tiles), LANE)
    grid_n = pl.cdiv(B, tb)     # may differ from num_tiles after lane rounding

    def resident(p):
        # Weights/biases stay VMEM-resident across all grid steps.
        return pl.BlockSpec(p.shape, lambda i: (0, 0))

    cost = pl.CostEstimate(flops=flops, transcendentals=0,
                           bytes_accessed=in_bytes + param_bytes + B * 4)
    out = pl.pallas_call(
        mlp_kernel_packed,
        out_shape=jax.ShapeDtypeStruct((1, B), jnp.float32),
        grid=(grid_n,),
        in_specs=[
            pl.BlockSpec((tb, fin), lambda i: (i, 0)),
            resident(w1p), resident(b1p),
            resident(w2p), resident(b2p),
            resident(w3p), resident(b3p),
            resident(w4c), resident(b4p),
        ],
        out_specs=pl.BlockSpec((1, tb), lambda i: (0, i)),
        compiler_params=pltpu.CompilerParams(
            dimension_semantics=("parallel",)),
        cost_estimate=cost,
    )(x, *packed)
    return out.reshape(B, 1)


def init_linear(key, fan_in, fan_out):
    # Mimic torch.nn.Linear default init: U(-1/sqrt(fan_in), 1/sqrt(fan_in)).
    kw, kb = jax.random.split(key)
    bound = 1.0 / jnp.sqrt(fan_in)
    # Stored as [in, out] (transposed vs PyTorch [out, in]).
    w = jax.random.uniform(kw, (fan_in, fan_out), jnp.float32, -bound, bound)
    b = jax.random.uniform(kb, (1, fan_out), jnp.float32, -bound, bound)
    return w, b


def reference_forward(x, params):
    h = x
    for i, (w, b) in enumerate(params):
        h = h @ w + b
        if i < len(params) - 1:
            h = jnp.maximum(h, 0.0)
    return h


if __name__ == "__main__":
    key = jax.random.PRNGKey(0)
    k_x1, k_x2, k_x3, k1, k2, k3, k4 = jax.random.split(key, 7)

    in_channels = 32
    params = [
        init_linear(k1, in_channels, 300),
        init_linear(k2, 300, 100),
        init_linear(k3, 100, 16),
        init_linear(k4, 16, 1),
    ]
    packed = pack_params(params)

    # Small-batch path (no grid, whole-array VMEM operands, no padding).
    x_small = jax.random.normal(k_x1, (8, in_channels), jnp.float32)
    out_small = jax.block_until_ready(baseline_1_forward(x_small, packed))
    ref_small = reference_forward(x_small, params)
    assert out_small.shape == (8, 1), out_small.shape
    assert jnp.allclose(out_small, ref_small, atol=1e-4, rtol=1e-4)

    # Batch-tiled path with a partial last block (1500 rows -> 4 tiles of 384):
    # exercises cdiv grid + masked partial-block I/O + even (v7x-friendly) tiles.
    x_mid = jax.random.normal(k_x2, (1500, in_channels), jnp.float32)
    out_mid = jax.block_until_ready(
        baseline_1_forward(x_mid, packed, batch_tile=512))
    ref_mid = reference_forward(x_mid, params)
    assert out_mid.shape == (1500, 1), out_mid.shape
    assert jnp.allclose(out_mid, ref_mid, atol=1e-4, rtol=1e-4)

    # Batch-tiled path with the default tile (2048 rows -> 2 tiles of 1024).
    x_big = jax.random.normal(k_x3, (2048, in_channels), jnp.float32)
    out_big = jax.block_until_ready(baseline_1_forward(x_big, packed))
    ref_big = reference_forward(x_big, params)
    assert out_big.shape == (2048, 1), out_big.shape
    assert jnp.allclose(out_big, ref_big, atol=1e-4, rtol=1e-4)

    print("KERNEL_OK")
</pallas_src>

<mosaic_0001>
module attributes {stable_mosaic.version = 11 : i64} {
  func.func @mlp_kernel_small(%arg0: memref<8x32xf32, #tpu.memory_space<vmem>>, %arg1: memref<32x384xf32, #tpu.memory_space<vmem>>, %arg2: memref<1x384xf32, #tpu.memory_space<vmem>>, %arg3: memref<384x128xf32, #tpu.memory_space<vmem>>, %arg4: memref<1x128xf32, #tpu.memory_space<vmem>>, %arg5: memref<128x128xf32, #tpu.memory_space<vmem>>, %arg6: memref<1x128xf32, #tpu.memory_space<vmem>>, %arg7: memref<128x1xf32, #tpu.memory_space<vmem>>, %arg8: memref<1x1xf32, #tpu.memory_space<vmem>>, %arg9: memref<8x128xf32, #tpu.memory_space<vmem>>) attributes {dimension_semantics = [], scalar_prefetch = 0 : i64, scratch_operands = 0 : i64, tpu.core_type = #tpu.core_type<tc>} {
    %c0 = arith.constant 0 : index
    %c0_0 = arith.constant 0 : index
    %0 = vector.load %arg0[%c0, %c0_0] : memref<8x32xf32, #tpu.memory_space<vmem>>, vector<8x32xf32>
    %c0_1 = arith.constant 0 : index
    %c0_2 = arith.constant 0 : index
    %1 = vector.load %arg1[%c0_1, %c0_2] : memref<32x384xf32, #tpu.memory_space<vmem>>, vector<32x384xf32>
    %cst = arith.constant dense<0.000000e+00> : vector<8x384xf32>
    %2 = tpu.matmul %0, %1, %cst {dimension_numbers = #tpu.dot_dimension_numbers<[1], [0], [0], [1], [0, 0, 1, 1], [], []>} : vector<8x32xf32>, vector<32x384xf32>, vector<8x384xf32> -> vector<8x384xf32>
    %c0_3 = arith.constant 0 : index
    %c0_4 = arith.constant 0 : index
    %3 = vector.load %arg2[%c0_3, %c0_4] : memref<1x384xf32, #tpu.memory_space<vmem>>, vector<1x384xf32>
    %4 = vector.broadcast %3 : vector<1x384xf32> to vector<8x384xf32>
    %5 = arith.addf %2, %4 : vector<8x384xf32>
    %cst_5 = arith.constant 0.000000e+00 : f32
    %6 = vector.broadcast %cst_5 : f32 to vector<8x384xf32>
    %7 = arith.maximumf %5, %6 : vector<8x384xf32>
    %c0_6 = arith.constant 0 : index
    %c0_7 = arith.constant 0 : index
    %8 = vector.load %arg3[%c0_6, %c0_7] : memref<384x128xf32, #tpu.memory_space<vmem>>, vector<384x128xf32>
    %cst_8 = arith.constant dense<0.000000e+00> : vector<8x128xf32>
    %9 = tpu.matmul %7, %8, %cst_8 {dimension_numbers = #tpu.dot_dimension_numbers<[1], [0], [0], [1], [0, 0, 1, 1], [], []>} : vector<8x384xf32>, vector<384x128xf32>, vector<8x128xf32> -> vector<8x128xf32>
    %c0_9 = arith.constant 0 : index
    %c0_10 = arith.constant 0 : index
    %10 = vector.load %arg4[%c0_9, %c0_10] : memref<1x128xf32, #tpu.memory_space<vmem>>, vector<1x128xf32>
    %11 = vector.broadcast %10 : vector<1x128xf32> to vector<8x128xf32>
    %12 = arith.addf %9, %11 : vector<8x128xf32>
    %cst_11 = arith.constant 0.000000e+00 : f32
    %13 = vector.broadcast %cst_11 : f32 to vector<8x128xf32>
    %14 = arith.maximumf %12, %13 : vector<8x128xf32>
    %c0_12 = arith.constant 0 : index
    %c0_13 = arith.constant 0 : index
    %15 = vector.load %arg5[%c0_12, %c0_13] : memref<128x128xf32, #tpu.memory_space<vmem>>, vector<128x128xf32>
    %cst_14 = arith.constant dense<0.000000e+00> : vector<8x128xf32>
    %16 = tpu.matmul %14, %15, %cst_14 {dimension_numbers = #tpu.dot_dimension_numbers<[1], [0], [0], [1], [0, 0, 1, 1], [], []>} : vector<8x128xf32>, vector<128x128xf32>, vector<8x128xf32> -> vector<8x128xf32>
    %c0_15 = arith.constant 0 : index
    %c0_16 = arith.constant 0 : index
    %17 = vector.load %arg6[%c0_15, %c0_16] : memref<1x128xf32, #tpu.memory_space<vmem>>, vector<1x128xf32>
    %18 = vector.broadcast %17 : vector<1x128xf32> to vector<8x128xf32>
    %19 = arith.addf %16, %18 : vector<8x128xf32>
    %cst_17 = arith.constant 0.000000e+00 : f32
    %20 = vector.broadcast %cst_17 : f32 to vector<8x128xf32>
    %21 = arith.maximumf %19, %20 : vector<8x128xf32>
    %c0_18 = arith.constant 0 : index
    %c0_19 = arith.constant 0 : index
    %22 = vector.load %arg7[%c0_18, %c0_19] : memref<128x1xf32, #tpu.memory_space<vmem>>, vector<128x1xf32>
    %cst_20 = arith.constant dense<0.000000e+00> : vector<8x1xf32>
    %23 = tpu.matmul %21, %22, %cst_20 {dimension_numbers = #tpu.dot_dimension_numbers<[1], [0], [0], [1], [0, 0, 1, 1], [], []>} : vector<8x128xf32>, vector<128x1xf32>, vector<8x1xf32> -> vector<8x1xf32>
    %c0_21 = arith.constant 0 : index
    %c0_22 = arith.constant 0 : index
    %24 = vector.load %arg8[%c0_21, %c0_22] : memref<1x1xf32, #tpu.memory_space<vmem>>, vector<1x1xf32>
    %25 = vector.broadcast %24 : vector<1x1xf32> to vector<8x1xf32>
    %26 = arith.addf %23, %25 : vector<8x1xf32>
    %27 = vector.shape_cast %26 : vector<8x1xf32> to vector<8x1xf32>
    %28 = vector.broadcast %27 : vector<8x1xf32> to vector<8x128xf32>
    %c0_23 = arith.constant 0 : index
    %c0_24 = arith.constant 0 : index
    %29 = vector.load %arg9[%c0_23, %c0_24] : memref<8x128xf32, #tpu.memory_space<vmem>>, vector<8x128xf32>
    tpu.vector_store %arg9[%c0_23, %c0_24], %28 {strides = array<i32>} : memref<8x128xf32, #tpu.memory_space<vmem>>, vector<8x128xf32>,
    return
  }
}

</mosaic_0001>

<bundles_post_ra>
// kernel: tpu_custom_call.1
= control target key start
LH: loop header
LB: loop body
LE: loop exit
PB: predicated region body
PF: predicated region fallthrough
CT: control target
= control target key end

     0   :  { %s1305_s0 = inlined_call_operand.vmem [shape: f32[8,32], index: 0, kind: input, shape index: {}]   ;;  %s1306_s1 = inlined_call_operand.hbm [shape: f32[32,384], index: 1, kind: input, shape index: {}]   ;;  %s1307_s2 = inlined_call_operand.vmem [shape: f32[1,384], index: 2, kind: input, shape index: {}]   ;;  %s1308_s3 = inlined_call_operand.hbm [shape: f32[384,128], index: 3, kind: input, shape index: {}]   ;;  %s1309_s4 = inlined_call_operand.vmem [shape: f32[1,128], index: 4, kind: input, shape index: {}]   ;;  %s1310_s5 = inlined_call_operand.vmem [shape: f32[128,128], index: 5, kind: input, shape index: {}]   ;;  %s1311_s6 = inlined_call_operand.vmem [shape: f32[1,128], index: 6, kind: input, shape index: {}]   ;;  %s1312_s7 = inlined_call_operand.vmem [shape: f32[128,1], index: 7, kind: input, shape index: {}]   ;;  %s1313_s8 = inlined_call_operand.<no memory space> [shape: f32[1,1], index: 8, kind: input, shape index: {}]   ;;  %s1314_s9 = inlined_call_operand.hbm [shape: f32[8,128], index: 9, kind: output, shape index: {}]  }
   0x1   :  { %v14_v0 = vstv %s1313_s8 }
   0x2   :  { %15 = vst [vmem:[#allocation2] sm:$0x1] %v14_v0 }
   0x3   :  { %16 = vsyncpa [#allocation4], 0 }
   0x4   :  { %17 = vsyncpa [#allocation7], 0 }
   0x5   :  { %18 = vsyncpa [#allocation5], 0  ;;  %s1060_s11 = smov [#allocation3]   ;;  %s988_s15 = scalar_lea.hbm %s1306_s1, 1536 }
   0x6   :  { %s26_s12 = sshll.u32 %s1060_s11, 4  ;;  %p989_p0 = scmp.ne.s32.totalorder %s1306_s1, %s988_s15  ;;  %s27_s12 = int_to_ptr.vmem [resolvable:$true] %s26_s12 }
   0x7   :  { %p992_p1 = scmp.lt.u32.totalorder %s988_s15, %s1306_s1 }
   0x9   :  { %p994_p2 = pnand %p992_p1, %p989_p0 }
   0xb   :  { %997 = shalt.err (!%p994_p2)
}
   0xc   :  { %s998_s8 = scalar_lea.vmem %s27_s12, 1536  ;;  %p1003_p4 = scmp.lt.s32.totalorder %s27_s12, %s27_s12 }
   0xd   :  { %p999_p3 = scmp.ne.s32.totalorder %s27_s12, %s998_s8  ;;  %p1004_p5 = scmp.lt.s32.totalorder %s998_s8, %s998_s8 }
   0xf   :  { %p1005_p6 = por %p1004_p5, %p1003_p4 }
  0x11   :  { %p1006_p7 = pnand %p1005_p6, %p999_p3 }
  0x13   :  { %1009 = shalt.err (!%p1006_p7)
}
  0x14   :  { %s1061_s20 = smov 384   ;;  %s1062_s21 = smov 24  }
  0x15   :  { %32 = dma.hbm_to_vmem [thread:$0]  %s1306_s1, 1536, %s27_s12, [#allocation4], %s1061_s20, %s1061_s20, %s1062_s21  }
  0x16   :  { %s1063_s24 = smov [#allocation6]   ;;  %s1010_s28 = scalar_lea.hbm %s1308_s3, 6144 }
  0x17   :  { %s40_s25 = sshll.u32 %s1063_s24, 4  ;;  %p1011_p8 = scmp.ne.s32.totalorder %s1308_s3, %s1010_s28  ;;  %s41_s25 = int_to_ptr.vmem [resolvable:$true] %s40_s25 }
  0x18   :  { %p1014_p9 = scmp.lt.u32.totalorder %s1010_s28, %s1308_s3 }
  0x1a   :  { %p1016_p10 = pnand %p1014_p9, %p1011_p8 }
  0x1c   :  { %1019 = shalt.err (!%p1016_p10)
}
  0x1d   :  { %s1020_s13 = scalar_lea.vmem %s41_s25, 6144  ;;  %p1025_p12 = scmp.lt.s32.totalorder %s41_s25, %s41_s25 }
  0x1e   :  { %p1021_p11 = scmp.ne.s32.totalorder %s41_s25, %s1020_s13  ;;  %p1026_p13 = scmp.lt.s32.totalorder %s1020_s13, %s1020_s13 }
  0x20   :  { %p1027_p0 = por %p1026_p13, %p1025_p12 }
  0x22   :  { %p1028_p1 = pnand %p1027_p0, %p1021_p11 }
  0x24   :  { %1031 = shalt.err (!%p1028_p1)
}
  0x25   :  { %s1064_s1 = smov 128   ;;  %s1065_s12 = smov 8  }
  0x26   :  { %46 = dma.hbm_to_vmem [thread:$0]  %s1308_s3, 6144, %s41_s25, [#allocation7], %s1064_s1, %s1064_s1, %s1065_s12  }
  0x27   :  { %1054 = dma.done.wait [#allocation4], 1536  }
  0x28   :  { %1055 = vsyncadd [#allocation4], 4294965760 }
  0x29   :  { %1056 = dma.done.wait [#allocation7], 6144  }
  0x2a   :  { %1057 = vsyncadd [#allocation7], 4294961152  ;;  %v1066_v1 = vmov 0.0|0.0   ;;  %v1067_v2 = vmov 0.0   ;;  %vm1068_vm0 = vmmov 0   ;;  %v65_v3 = vld [vmem:[#allocation3 + $0x8] sm:$0xff] }
  0x2b   :  { %866 = vmatprep.subr.bf16.mxu1 %v1066_v1  ;;  %161 = vmatprep.mubr.f32.mxu0 %v1067_v2  ;;  %v68_v4 = vld [vmem:[#allocation3 + $0x20] sm:$0xff]  ;;  %v67_v7 = vld [vmem:[#allocation3 + $0x18] sm:$0xff]  ;;  %v74_v9 = vld [vmem:[#allocation3 + $0x50] sm:$0xff]  ;;  %vm93_vm1 = vcmask 261120  }
  0x2c   :  { %750 = vmatprep.mubr.msk.f32.mxu1 %vm1068_vm0, %v1067_v2  ;;  %v64_v5 = vld [vmem:[#allocation3] sm:$0xff]  ;;  %v858_v6 = vpack.c.bf16 %v68_v4, %v65_v3  ;;  %v71_v8 = vld [vmem:[#allocation3 + $0x38] sm:$0xff]  ;;  %v70_v12 = vld [vmem:[#allocation3 + $0x30] sm:$0xff] }
  0x2d   :  { %v860_v10 = vpack.c.bf16 %v67_v7, %v64_v5  ;;  %v862_v11 = vpack.c.bf16 %v74_v9, %v71_v8  ;;  %v73_v13 = vld [vmem:[#allocation3 + $0x48] sm:$0xff]  ;;  %v66_v14 = vld [vmem:[#allocation3 + $0x10] sm:$0xff]  ;;  %v72_v16 = vld [vmem:[#allocation3 + $0x40] sm:$0xff] }
  0x2e   :  { %859 = vmatprep.subr.bf16.mxu0 %v858_v6  ;;  %v69_v15 = vld [vmem:[#allocation3 + $0x28] sm:$0xff]  ;;  %v864_v17 = vpack.c.bf16 %v73_v13, %v70_v12  ;;  %v75_v19 = vld [vmem:[#allocation3 + $0x58] sm:$0xff]  ;;  %v257_v20 = vld [vmem:[#allocation6 + $0x80] sm:$0xff] }
  0x2f   :  { %861 = vmatpush1.bf16.msra.mxu0 %v860_v10  ;;  %v867_v18 = vpack.c.bf16 %v69_v15, %v66_v14  ;;  %v258_v21 = vld [vmem:[#allocation6 + $0x88] sm:$0xff]  ;;  %v241_v23 = vld [vmem:[#allocation6] sm:$0xff]  ;;  %v870_v25 = vpack.c.bf16 %v75_v19, %v72_v16  ;;  %v259_v26 = vld [vmem:[#allocation6 + $0x90] sm:$0xff] }
  0x30   :  { %863 = vmatprep.subr.bf16.mxu0 %v862_v11  ;;  %v872_v22 = vpack.c.bf16 %v258_v21, %v257_v20  ;;  %v242_v24 = vld [vmem:[#allocation6 + $0x8] sm:$0xff]  ;;  %v260_v27 = vld [vmem:[#allocation6 + $0x98] sm:$0xff]  ;;  %v273_v28 = vld [vmem:[#allocation6 + $0x100] sm:$0xff] }
  0x31   :  { %868 = vmatpush3.bf16.msra.mxu1 %v867_v18  ;;  %v274_v29 = vld [vmem:[#allocation6 + $0x108] sm:$0xff]  ;;  %v63_v30 = vld [vmem:[%s1305_s0] sm:$0xff]  ;;  %v874_v31 = vpack.c.bf16 %v242_v24, %v241_v23  ;;  %v876_v32 = vpack.c.bf16 %v260_v27, %v259_v26  ;;  %v243_v33 = vld [vmem:[#allocation6 + $0x10] sm:$0xff] }
  0x32   :  { %869 = vmatprep.subr.bf16.mxu1 %v1066_v1  ;;  %v244_v34 = vld [vmem:[#allocation6 + $0x18] sm:$0xff]  ;;  %v905_v35 = vpack.c.bf16 %v274_v29, %v273_v28  ;;  %v261_v36 = vld [vmem:[#allocation6 + $0xa0] sm:$0xff]  ;;  %v262_v37 = vld [vmem:[#allocation6 + $0xa8] sm:$0xff] }
  0x33   :  { %865 = vmatpush1.bf16.msra.mxu0 %v864_v17  ;;  %v275_v38 = vld [vmem:[#allocation6 + $0x110] sm:$0xff]  ;;  %v276_v39 = vld [vmem:[#allocation6 + $0x118] sm:$0xff]  ;;  %v878_v40 = vpack.c.bf16 %v244_v34, %v243_v33  ;;  %v880_v41 = vpack.c.bf16 %v262_v37, %v261_v36  ;;  %v245_v42 = vld [vmem:[#allocation6 + $0x20] sm:$0xff] }
  0x34   :  { %873 = vmatprep.subr.bf16.mxu0 %v872_v22  ;;  %v246_v43 = vld [vmem:[#allocation6 + $0x28] sm:$0xff]  ;;  %v908_v44 = vpack.c.bf16 %v276_v39, %v275_v38  ;;  %v263_v45 = vld [vmem:[#allocation6 + $0xb0] sm:$0xff]  ;;  %v264_v46 = vld [vmem:[#allocation6 + $0xb8] sm:$0xff] }
  0x35   :  { %871 = vmatpush3.bf16.msra.mxu1 %v870_v25  ;;  %v277_v47 = vld [vmem:[#allocation6 + $0x120] sm:$0xff]  ;;  %v278_v48 = vld [vmem:[#allocation6 + $0x128] sm:$0xff]  ;;  %v882_v49 = vpack.c.bf16 %v246_v43, %v245_v42  ;;  %v884_v50 = vpack.c.bf16 %v264_v46, %v263_v45  ;;  %v247_v51 = vld [vmem:[#allocation6 + $0x30] sm:$0xff] }
  0x36   :  { %646 = vmatmul.mubr.msk.f32.vlgmr.msra.gmra.mrb[0].mxu0 %vm93_vm1, %v63_v30  ;;  %904 = vmatprep.subr.bf16.mxu1 %v1066_v1  ;;  %v248_v52 = vld [vmem:[#allocation6 + $0x38] sm:$0xff]  ;;  %v911_v53 = vpack.c.bf16 %v278_v48, %v277_v47  ;;  %v265_v54 = vld [vmem:[#allocation6 + $0xc0] sm:$0xff]  ;;  %v266_v55 = vld [vmem:[#allocation6 + $0xc8] sm:$0xff] }
  0x37   :  { %875 = vmatpush3.bf16.msra.mxu0 %v874_v31  ;;  %v279_v56 = vld [vmem:[#allocation6 + $0x130] sm:$0xff]  ;;  %v280_v57 = vld [vmem:[#allocation6 + $0x138] sm:$0xff]  ;;  %v886_v58 = vpack.c.bf16 %v248_v52, %v247_v51  ;;  %v888_v59 = vpack.c.bf16 %v266_v55, %v265_v54  ;;  %v249_v60 = vld [vmem:[#allocation6 + $0x40] sm:$0xff] }
  0x38   :  { %751 = vmatmul.mubr.msk.f32.vlgmr.msra.gmra.mrb[0].mxu1 %vm93_vm1, %v63_v30  ;;  %877 = vmatprep.subr.bf16.mxu0 %v876_v32  ;;  %v250_v61 = vld [vmem:[#allocation6 + $0x48] sm:$0xff]  ;;  %v914_v62 = vpack.c.bf16 %v280_v57, %v279_v56  ;;  %v267_v63 = vld [vmem:[#allocation6 + $0xd0] sm:$0xff]  ;;  %v268_v0 = vld [vmem:[#allocation6 + $0xd8] sm:$0xff]  ;;  %v78_v32 = vlaneseq }
  0x39   :  { %906 = vmatpush3.bf16.msra.mxu1 %v905_v35  ;;  %785 = vmatprep.mubr.msk.f32.mxu1 %vm1068_vm0, %v1067_v2  ;;  %v281_v3 = vld [vmem:[#allocation6 + $0x140] sm:$0xff]  ;;  %v282_v4 = vld [vmem:[#allocation6 + $0x148] sm:$0xff]  ;;  %v890_v5 = vpack.c.bf16 %v250_v61, %v249_v60  ;;  %v892_v6 = vpack.c.bf16 %v268_v0, %v267_v63  ;;  %v251_v7 = vld [vmem:[#allocation6 + $0x50] sm:$0xff] }
  0x3a   :  { %907 = vmatprep.subr.bf16.mxu1 %v1066_v1  ;;  %v252_v8 = vld [vmem:[#allocation6 + $0x58] sm:$0xff]  ;;  %v917_v9 = vpack.c.bf16 %v282_v4, %v281_v3  ;;  %v269_v10 = vld [vmem:[#allocation6 + $0xe0] sm:$0xff]  ;;  %v270_v11 = vld [vmem:[#allocation6 + $0xe8] sm:$0xff]  ;;  %v79_v33 = vshrl.u32 %v78_v32, 7 }
  0x3b   :  { %879 = vmatpush3.bf16.msra.mxu0 %v878_v40  ;;  %v894_v12 = vpack.c.bf16 %v252_v8, %v251_v7  ;;  %v896_v13 = vpack.c.bf16 %v270_v11, %v269_v10  ;;  %v253_v14 = vld [vmem:[#allocation6 + $0x60] sm:$0xff]  ;;  %v254_v15 = vld [vmem:[#allocation6 + $0x68] sm:$0xff]  ;;  %v283_v16 = vld [vmem:[#allocation6 + $0x150] sm:$0xff] }
  0x3c   :  { %881 = vmatprep.subr.bf16.mxu0 %v880_v41  ;;  %v898_v17 = vpack.c.bf16 %v254_v15, %v253_v14  ;;  %v284_v18 = vld [vmem:[#allocation6 + $0x158] sm:$0xff]  ;;  %v271_v20 = vld [vmem:[#allocation6 + $0xf0] sm:$0xff]  ;;  %v285_v25 = vld [vmem:[#allocation6 + $0x160] sm:$0xff]  ;;  %v80_v34 = vsub.s32 0, %v79_v33  ;;  %v84_v36 = vsub.s32 1, %v79_v33  ;;  %v88_v37 = vsub.s32 2, %v79_v33 }
  0x3d   :  { %909 = vmatpush3.bf16.msra.mxu1 %v908_v44  ;;  %v920_v19 = vpack.c.bf16 %v284_v18, %v283_v16  ;;  %v272_v21 = vld [vmem:[#allocation6 + $0xf8] sm:$0xff]  ;;  %v255_v23 = vld [vmem:[#allocation6 + $0x70] sm:$0xff]  ;;  %v286_v27 = vld [vmem:[#allocation6 + $0x168] sm:$0xff] }
  0x3e   :  { %910 = vmatprep.subr.bf16.mxu1 %v1066_v1  ;;  %v900_v22 = vpack.c.bf16 %v272_v21, %v271_v20  ;;  %v256_v24 = vld [vmem:[#allocation6 + $0x78] sm:$0xff]  ;;  %v923_v28 = vpack.c.bf16 %v286_v27, %v285_v25  ;;  %v287_v29 = vld [vmem:[#allocation6 + $0x170] sm:$0xff]  ;;  %v438_v45 = vld [vmem:[%s1310_s5 + $0x8] sm:$0xff] }
  0x3f   :  { %883 = vmatpush3.bf16.msra.mxu0 %v882_v49  ;;  %v902_v26 = vpack.c.bf16 %v256_v24, %v255_v23  ;;  %v288_v30 = vld [vmem:[#allocation6 + $0x178] sm:$0xff]  ;;  %v439_v54 = vld [vmem:[%s1310_s5 + $0x10] sm:$0xff]  ;;  %v446_v63 = vld [vmem:[%s1310_s5 + $0x48] sm:$0xff] }
  0x40   :  { %885 = vmatprep.subr.bf16.mxu0 %v884_v50  ;;  %v926_v31 = vpack.c.bf16 %v288_v30, %v287_v29  ;;  %v76_v35 = vld [vmem:[%s1307_s2] sm:$0x7]  ;;  %v440_v55 = vld [vmem:[%s1310_s5 + $0x18] sm:$0xff]  ;;  %v443_v60 = vld [vmem:[%s1310_s5 + $0x30] sm:$0xff] }
  0x41   :  { %912 = vmatpush3.bf16.msra.mxu1 %v911_v53  ;;  %v81_v38 = vrot.slane %v76_v35, %v80_v34  ;;  %v85_v39 = vrot.slane %v76_v35, %v84_v36  ;;  %v89_v40 = vrot.slane %v76_v35, %v88_v37  ;;  %v437_v44 = vld [vmem:[%s1310_s5] sm:$0xff]  ;;  %v932_v56 = vpack.c.bf16 %v440_v55, %v439_v54  ;;  %v444_v61 = vld [vmem:[%s1310_s5 + $0x38] sm:$0xff]  ;;  %v447_v3 = vld [vmem:[%s1310_s5 + $0x50] sm:$0xff] }
  0x42   :  { %913 = vmatprep.subr.bf16.mxu1 %v1066_v1  ;;  %v929_v51 = vpack.c.bf16 %v438_v45, %v437_v44  ;;  %v441_v57 = vld [vmem:[%s1310_s5 + $0x20] sm:$0xff]  ;;  %v448_v4 = vld [vmem:[%s1310_s5 + $0x58] sm:$0xff]  ;;  %v450_v7 = vld [vmem:[%s1310_s5 + $0x68] sm:$0xff] }
  0x43   :  { %887 = vmatpush3.bf16.msra.mxu0 %v886_v58  ;;  %v442_v58 = vld [vmem:[%s1310_s5 + $0x28] sm:$0xff]  ;;  %v452_v10 = vld [vmem:[%s1310_s5 + $0x78] sm:$0xff]  ;;  %v533_v14 = vld [vmem:[%s1312_s7 + $0x10] sm:$0xff] }
  0x44   :  { %889 = vmatprep.subr.bf16.mxu0 %v888_v59  ;;  %v935_v59 = vpack.c.bf16 %v442_v58, %v441_v57  ;;  %v534_v16 = vld [vmem:[%s1312_s7 + $0x18] sm:$0xff]  ;;  %v535_v18 = vld [vmem:[%s1312_s7 + $0x20] sm:$0xff]  ;;  %v537_v21 = vld [vmem:[%s1312_s7 + $0x30] sm:$0xff] }
  0x45   :  { %915 = vmatpush3.bf16.msra.mxu1 %v914_v62  ;;  %v938_v62 = vpack.c.bf16 %v444_v61, %v443_v60  ;;  %v539_v24 = vld [vmem:[%s1312_s7 + $0x40] sm:$0xff]  ;;  %v540_v25 = vld [vmem:[%s1312_s7 + $0x48] sm:$0xff]  ;;  %v541_v27 = vld [vmem:[%s1312_s7 + $0x50] sm:$0xff] }
  0x46   :  { %916 = vmatprep.subr.bf16.mxu1 %v1066_v1  ;;  %v543_v30 = vld [vmem:[%s1312_s7 + $0x60] sm:$0xff] }
  0x47   :  { %891 = vmatpush3.bf16.msra.mxu0 %v890_v5  ;;  %v944_v5 = vpack.c.bf16 %v448_v4, %v447_v3  ;;  %v648_v36 = vld [vmem:[%s1309_s4] ss:$0 sm:$0xff]  ;;  %s1070_s4 = smov [#allocation8]  }
  0x48   :  { %893 = vmatprep.subr.bf16.mxu0 %v892_v6  ;;  %v449_v6 = vld [vmem:[%s1310_s5 + $0x60] sm:$0xff] }
  0x49   :  { %918 = vmatpush3.bf16.msra.mxu1 %v917_v9  ;;  %v947_v8 = vpack.c.bf16 %v450_v7, %v449_v6  ;;  %v451_v9 = vld [vmem:[%s1310_s5 + $0x70] sm:$0xff]  ;;  %v649_v44 = vld [vmem:[%s1311_s6] ss:$0 sm:$0xff] }
  0x4a   :  { %919 = vmatprep.subr.bf16.mxu1 %v1066_v1  ;;  %v950_v11 = vpack.c.bf16 %v452_v10, %v451_v9 }
  0x4b   :  { %895 = vmatpush3.bf16.msra.mxu0 %v894_v12  ;;  %v531_v12 = vld [vmem:[%s1312_s7] sm:$0xff] }
  0x4c   :  { %897 = vmatprep.subr.bf16.mxu0 %v896_v13  ;;  %v532_v13 = vld [vmem:[%s1312_s7 + $0x8] sm:$0xff] }
  0x4d   :  { %921 = vmatpush3.bf16.msra.mxu1 %v920_v19  ;;  %v953_v15 = vpack.c.bf16 %v532_v13, %v531_v12  ;;  %v536_v19 = vld [vmem:[%s1312_s7 + $0x28] sm:$0xff] }
  0x4e   :  { %922 = vmatprep.subr.bf16.mxu1 %v1066_v1  ;;  %v959_v20 = vpack.c.bf16 %v536_v19, %v535_v18 }
  0x4f   :  { %899 = vmatpush3.bf16.msra.mxu0 %v898_v17  ;;  %v956_v17 = vpack.c.bf16 %v534_v16, %v533_v14 }
  0x50   :  { %901 = vmatprep.subr.bf16.mxu0 %v900_v22  ;;  %v538_v22 = vld [vmem:[%s1312_s7 + $0x38] sm:$0xff] }
  0x51   :  { %924 = vmatpush3.bf16.msra.mxu1 %v923_v28  ;;  %v962_v23 = vpack.c.bf16 %v538_v22, %v537_v21  ;;  %v542_v28 = vld [vmem:[%s1312_s7 + $0x58] sm:$0xff] }
  0x52   :  { %925 = vmatprep.subr.bf16.mxu1 %v1066_v1  ;;  %v968_v29 = vpack.c.bf16 %v542_v28, %v541_v27 }
  0x53   :  { %903 = vmatpush3.bf16.msra.mxu0 %v902_v26  ;;  %v965_v26 = vpack.c.bf16 %v540_v25, %v539_v24 }
  0x54   :  { %928 = vmatprep.subr.bf16.mxu0 %v1066_v1 }
  0x55   :  { %927 = vmatpush3.bf16.msra.mxu1 %v926_v31  ;;  %v544_v31 = vld [vmem:[%s1312_s7 + $0x68] sm:$0xff] }
  0x56   :  { %952 = vmatprep.subr.bf16.mxu1 %v1066_v1  ;;  %v971_v32 = vpack.c.bf16 %v544_v31, %v543_v30 }
 0x109   :  { %v163_v41 = vpop.f32.mrb[0].mxu0 }
 0x10a   :  { %v164_v42 = vadd.f32 %v163_v41, %v81_v38  ;;  %v165_v43 = vpop.f32.mrb[1].mxu0 }
 0x10b   :  { %v166_v46 = vadd.f32 %v165_v43, %v85_v39  ;;  %v234_v47 = vpop.f32.mrb[0].mxu1 }
 0x10c   :  { %v235_v48 = vadd.f32 %v234_v47, %v89_v40  ;;  %v752_v49 = vpop.f32.mrb[1].mxu1  ;;  %v238_v52 = vmax.f32 %v164_v42, 0.0  ;;  %v545_v42 = vld [vmem:[%s1312_s7 + $0x70] sm:$0xff] }
 0x10d   :  { %v239_v50 = vmax.f32 %v166_v46, 0.0  ;;  %v1069_v49 = vmov 0  }
 0x10e   :  { %v240_v53 = vmax.f32 %v235_v48, 0.0  ;;  %987 = vset.pattern.permute.xlu0 %v1069_v49 }
 0x10f   :  { %360 = vmatprep.mubr.f32.mxu0 %v239_v50  ;;  %v650_v50 = vld [vmem:[#allocation2] ss:$0 sm:$0xff] }
 0x110   :  { %361 = vmatmul.mubr.f32.vlgmr.msra.gmra.mrb[2].mxu0 %v238_v52  ;;  %786 = vmatmul.mubr.f32.vlgmr.msra.gmra.mrb[2].mxu1 %v240_v53 }
 0x111   :  { %930 = vmatpush3.bf16.msra.mxu0 %v929_v51  ;;  %820 = vmatprep.mubr.msk.f32.mxu0 %vm1068_vm0, %v1067_v2 }
 0x112   :  { %931 = vmatprep.subr.bf16.mxu0 %v1066_v1  ;;  %855 = vmatprep.mubr.msk.f32.mxu1 %vm1068_vm0, %v1067_v2  ;;  %v445_v2 = vld [vmem:[%s1310_s5 + $0x40] sm:$0xff] }
 0x113   :  { %v941_v0 = vpack.c.bf16 %v446_v63, %v445_v2  ;;  %954 = vmatpush3.bf16.msra.mxu1 %v953_v15 }
 0x114   :  { %955 = vmatprep.subr.bf16.mxu1 %v1066_v1 }
 0x115   :  { %933 = vmatpush3.bf16.msra.mxu0 %v932_v56 }
 0x116   :  { %934 = vmatprep.subr.bf16.mxu0 %v1066_v1 }
 0x117   :  { %957 = vmatpush3.bf16.msra.mxu1 %v956_v17 }
 0x118   :  { %958 = vmatprep.subr.bf16.mxu1 %v1066_v1 }
 0x119   :  { %936 = vmatpush3.bf16.msra.mxu0 %v935_v59 }
 0x11a   :  { %937 = vmatprep.subr.bf16.mxu0 %v1066_v1 }
 0x11b   :  { %960 = vmatpush3.bf16.msra.mxu1 %v959_v20 }
 0x11c   :  { %961 = vmatprep.subr.bf16.mxu1 %v1066_v1 }
 0x11d   :  { %939 = vmatpush3.bf16.msra.mxu0 %v938_v62 }
 0x11e   :  { %940 = vmatprep.subr.bf16.mxu0 %v1066_v1 }
 0x11f   :  { %963 = vmatpush3.bf16.msra.mxu1 %v962_v23 }
 0x120   :  { %964 = vmatprep.subr.bf16.mxu1 %v1066_v1 }
 0x121   :  { %942 = vmatpush3.bf16.msra.mxu0 %v941_v0 }
 0x122   :  { %943 = vmatprep.subr.bf16.mxu0 %v1066_v1 }
 0x123   :  { %966 = vmatpush3.bf16.msra.mxu1 %v965_v26 }
 0x124   :  { %967 = vmatprep.subr.bf16.mxu1 %v1066_v1 }
 0x125   :  { %945 = vmatpush3.bf16.msra.mxu0 %v944_v5 }
 0x126   :  { %946 = vmatprep.subr.bf16.mxu0 %v1066_v1 }
 0x127   :  { %969 = vmatpush3.bf16.msra.mxu1 %v968_v29 }
 0x128   :  { %970 = vmatprep.subr.bf16.mxu1 %v1066_v1 }
 0x129   :  { %948 = vmatpush3.bf16.msra.mxu0 %v947_v8 }
 0x12a   :  { %949 = vmatprep.subr.bf16.mxu0 %v1066_v1 }
 0x12b   :  { %972 = vmatpush3.bf16.msra.mxu1 %v971_v32 }
 0x12c   :  { %973 = vmatprep.subr.bf16.mxu1 %v1066_v1  ;;  %v546_v1 = vld [vmem:[%s1312_s7 + $0x78] sm:$0xff]  ;;  %s636_s7 = sshll.u32 %s1070_s4, 4  ;;  %s637_s7 = int_to_ptr.vmem [resolvable:$true] %s636_s7 }
 0x12d   :  { %951 = vmatpush3.bf16.msra.mxu0 %v950_v11  ;;  %v974_v43 = vpack.c.bf16 %v546_v1, %v545_v42  ;;  %s1032_s30 = scalar_lea.vmem %s637_s7, 128  ;;  %p1037_p3 = scmp.lt.s32.totalorder %s637_s7, %s637_s7 }
 0x12e   :  { %p1033_p2 = scmp.ne.s32.totalorder %s637_s7, %s1032_s30  ;;  %p1038_p4 = scmp.lt.s32.totalorder %s1032_s30, %s1032_s30 }
 0x12f   :  { %975 = vmatpush3.bf16.msra.mxu1 %v974_v43 }
 0x130   :  { %p1039_p5 = por %p1038_p4, %p1037_p3 }
 0x132   :  { %p1040_p6 = pnand %p1039_p5, %p1033_p2 }
 0x1e3   :  { %v688_v33 = vpop.f32.mrb[2].mxu0  ;;  %v432_v34 = vpop.f32.mrb[2].mxu1 }
 0x1e4   :  { %v689_v35 = vpop.f32.mrb[3].mxu0  ;;  %v787_v37 = vpop.f32.mrb[3].mxu1 }
 0x1e5   :  { %v690_v38 = vadd.f32 %v689_v35, %v688_v33 }
 0x1e7   :  { %v363_v39 = vadd.f32 %v690_v38, %v648_v36 }
 0x1e9   :  { %v433_v40 = vadd.f32 %v432_v34, %v363_v39 }
 0x1eb   :  { %v436_v41 = vmax.f32 %v433_v40, 0.0 }
 0x1ed   :  { %821 = vmatmul.mubr.f32.vlgmr.msra.gmra.mrb[4].mxu0 %v436_v41 }
 0x2c0   :  { %v526_v45 = vpop.f32.mrb[4].mxu0 }
 0x2c1   :  { %v527_v46 = vadd.f32 %v649_v44, %v526_v45  ;;  %v822_v47 = vpop.f32.mrb[5].mxu0 }
 0x2c3   :  { %v530_v48 = vmax.f32 %v527_v46, 0.0 }
 0x2c5   :  { %856 = vmatmul.mubr.f32.vlgmr.msra.gmra.mrb[4].mxu1 %v530_v48 }
 0x398   :  { %v620_v51 = vpop.f32.mrb[4].mxu1 }
 0x399   :  { %v621_v52 = vadd.f32 %v650_v50, %v620_v51  ;;  %v857_v53 = vpop.f32.mrb[5].mxu1 }
 0x39b   :  { %626 = vperm.xlu0 %987, %v621_v52  }
 0x41a   :  { %v627_v54 = vpop.permute.xlu0 %626 }
 0x41b   :  { %629 = vst [vmem:[#allocation8] sm:$0xff] %v627_v54 }
 0x41c   :  { %1043 = shalt.err (!%p1040_p6)
}
 0x41d   :  { %s1044_s11 = scalar_lea.hbm %s1314_s9, 128 }
 0x41e   :  { %p1045_p7 = scmp.ne.s32.totalorder %s1314_s9, %s1044_s11  ;;  %p1048_p8 = scmp.lt.u32.totalorder %s1044_s11, %s1314_s9 }
 0x420   :  { %p1050_p9 = pnand %p1048_p8, %p1045_p7 }
 0x422   :  { %1053 = shalt.err (!%p1050_p9)
}
 0x423   :  { %639 = dma.vmem_to_hbm [thread:$0]  %s637_s7, 128, %s1314_s9, [#allocation5]  }
 0x424   :  { %1058 = dma.done.wait [#allocation5], 128  }
 0x425   :  { %1059 = vsyncadd [#allocation5], 4294967168 }
 0x426   :  { %643 = vsyncpa [#allocation4], 1 }
 0x427   :  { %644 = vsyncpa [#allocation7], 1 }
 0x428   :  { %645 = vsyncpa [#allocation5], 1 }

</bundles_post_ra>
